<compile_context>
chip_gen: v7x
topology: tpu7x:2x2x1
jax: 0.10.0
libtpu: 0.0.40
codegen_flags: <defaults>
</compile_context>

<pallas_src>
import functools

import jax
import jax.numpy as jnp
from jax.experimental import pallas as pl
from jax.experimental.pallas import tpu as pltpu


def _round_up(x, m):
    return (x + m - 1) // m * m


def _largest_ff_tile(d_ff, target):
    """Largest multiple-of-128 divisor of d_ff that is <= target (else d_ff)."""
    target = max(128, min(target, d_ff))
    for t in range(target - target % 128, 0, -128):
        if d_ff % t == 0:
            return t
    return d_ff  # d_ff not a multiple of 128: no ff tiling


def _auto_ff_tile(d_model, d_ff, weight_bytes, x_bytes, tm,
                  vmem_budget=48 * 1024 * 1024):
    """Pick the ff tile so the double-buffered streams fit a VMEM budget."""
    # Resident per row-tile: x tile + out tile (double-buffered) + f32 acc.
    fixed = 4 * tm * d_model * x_bytes + tm * d_model * 4
    # Streamed per ff step (double-buffered): w13 (d_model, 2*tff)  +  w2 (tff, d_model).
    per_tff = 2 * 3 * d_model * weight_bytes
    avail = max(vmem_budget - fixed, 128 * per_tff)
    target = max(128, (avail // per_tff) // 128 * 128)
    return _largest_ff_tile(d_ff, target)


def _swiglu_kernel(x_ref, w13_ref, w2_ref, o_ref, acc_ref, *, tff):
    # x_ref:   (tm, d_model)      -- same block every ff step (stays resident)
    # w13_ref: (d_model, 2*tff)   -- [w1 tile | w3 tile], streamed per ff step
    # w2_ref:  (tff, d_model)     -- streamed per ff step
    # o_ref:   (tm, d_model)      -- same block every ff step (resident)
    # acc_ref: (tm, d_model) f32 scratch accumulator
    f = pl.program_id(1)

    @pl.when(f == 0)
    def _():
        acc_ref[...] = jnp.zeros_like(acc_ref)

    # Single fused up-projection: one pass of x through the MXU per ff tile.
    h = jnp.dot(x_ref[...], w13_ref[...], preferred_element_type=jnp.float32)
    h1 = h[:, :tff]
    h3 = h[:, tff:]
    # silu(h1) * h3 in f32 (sigmoid's exp runs on the EUP, off the MXU path).
    g = (h1 * jax.nn.sigmoid(h1)) * h3

    # Down-projection of this ff tile, accumulated in f32.
    acc_ref[...] += jnp.dot(g.astype(w2_ref.dtype), w2_ref[...],
                            preferred_element_type=jnp.float32)

    @pl.when(f == pl.num_programs(1) - 1)
    def _():
        o_ref[...] = acc_ref[...].astype(o_ref.dtype)


def prepare_swiglu_params(w1, w2, w3, *, tm=256, tff=None):
    """One-time weight prep (hoisted out of the per-call path).

    w1, w3: (d_ff, d_model); w2: (d_model, d_ff)   -- PyTorch Linear layout.
    Returns (w13, w2t, tff) where
      w13: (d_model, 2*d_ff); ff-block f (width 2*tff) = [w1_f^T | w3_f^T]
      w2t: (d_ff, d_model)
    """
    d_ff, d_model = w1.shape
    wbytes = jnp.dtype(w1.dtype).itemsize
    if tff is None:
        tff = _auto_ff_tile(d_model, d_ff, wbytes, wbytes, tm)
    else:
        tff = _largest_ff_tile(d_ff, tff)
    n_ff = d_ff // tff
    w1t = w1.T.reshape(d_model, n_ff, tff)
    w3t = w3.T.reshape(d_model, n_ff, tff)
    w13 = jnp.concatenate([w1t, w3t], axis=-1).reshape(d_model, 2 * d_ff)
    w2t = w2.T
    return w13, w2t, tff


def swiglu_pallas(x, w13, w2t, tff, *, tm=256):
    """x: [..., d_model]; (w13, w2t, tff) from prepare_swiglu_params."""
    orig_shape = x.shape
    d_model = orig_shape[-1]
    d_ff = w2t.shape[0]
    assert w13.shape == (d_model, 2 * d_ff)
    assert d_ff % tff == 0
    n_ff = d_ff // tff

    x2d = x.reshape(-1, d_model)
    M = x2d.shape[0]

    # Row tile: clamp for tiny problems, keep a multiple of 8 (sublanes),
    # pad the row count so any batch*seq works.
    tm = max(8, min(tm, _round_up(M, 8)))
    tm = _round_up(tm, 8)
    m_pad = _round_up(M, tm)
    if m_pad != M:
        x2d = jnp.pad(x2d, ((0, m_pad - M), (0, 0)))

    cost = pl.CostEstimate(
        flops=6 * m_pad * d_model * d_ff,          # up-proj (2x) + down-proj
        transcendentals=m_pad * d_ff,              # sigmoid
        bytes_accessed=(x2d.size * x2d.dtype.itemsize
                        + w13.size * w13.dtype.itemsize
                        + w2t.size * w2t.dtype.itemsize
                        + m_pad * d_model * jnp.dtype(x.dtype).itemsize),
    )

    out2d = pl.pallas_call(
        functools.partial(_swiglu_kernel, tff=tff),
        out_shape=jax.ShapeDtypeStruct((m_pad, d_model), x.dtype),
        grid_spec=pltpu.PrefetchScalarGridSpec(
            num_scalar_prefetch=0,
            grid=(m_pad // tm, n_ff),
            in_specs=[
                pl.BlockSpec((tm, d_model), lambda i, f: (i, 0)),
                pl.BlockSpec((d_model, 2 * tff), lambda i, f: (0, f)),
                pl.BlockSpec((tff, d_model), lambda i, f: (f, 0)),
            ],
            out_specs=pl.BlockSpec((tm, d_model), lambda i, f: (i, 0)),
            scratch_shapes=[pltpu.VMEM((tm, d_model), jnp.float32)],
        ),
        compiler_params=pltpu.CompilerParams(
            dimension_semantics=("parallel", "arbitrary"),
            # Raise the scoped-VMEM ceiling above the 16/32 MiB defaults so the
            # large weight tiles double-buffer; actual usage is kept under the
            # ~48 MiB tiling budget so it also fits v7x's 64 MiB physical VMEM.
            vmem_limit_bytes=64 * 1024 * 1024,
        ),
        cost_estimate=cost,
    )(x2d, w13, w2t)

    if m_pad != M:
        out2d = out2d[:M]
    return out2d.reshape(orig_shape)


# ----------------------------- test helpers ---------------------------------

def init_linear_weight(key, in_features, out_features, dtype=jnp.float32):
    # Mirrors torch.nn.init.trunc_normal_(w, 0, std, -3*std, 3*std)
    std = 2.0 / (in_features + out_features)
    w = jax.random.truncated_normal(
        key, -3.0, 3.0, (out_features, in_features), dtype=jnp.float32) * std
    return w.astype(dtype)


def swiglu_ref(x, w1, w2, w3):
    h = jax.nn.silu(x @ w1.T) * (x @ w3.T)
    return h @ w2.T


def _check(out, ref, tol=5e-3):
    assert out.shape == ref.shape
    rel = jnp.linalg.norm(out - ref) / (jnp.linalg.norm(ref) + 1e-30)
    assert float(rel) < tol, f"relative error too high: {float(rel)}"


if __name__ == "__main__":
    # Small but lane-dense shapes (d_model multiple of 128, d_ff multiple of 128).
    batch, seq, d_model, d_ff = 2, 8, 128, 256

    key = jax.random.PRNGKey(0)
    kx, k1, k2, k3, kx2 = jax.random.split(key, 5)

    w1 = init_linear_weight(k1, d_model, d_ff)   # (d_ff, d_model)
    w2 = init_linear_weight(k2, d_ff, d_model)   # (d_model, d_ff)
    w3 = init_linear_weight(k3, d_model, d_ff)   # (d_ff, d_model)

    x = jax.random.normal(kx, (batch, seq, d_model), dtype=jnp.float32)
    x2 = jax.random.normal(kx2, (batch, 5, d_model), dtype=jnp.float32)

    # Case 1: forced tff=128 / tm=8 so both grid axes have >1 step
    # (exercises accumulator init/finalize and block revisiting).
    w13_s, w2t_s, tff_s = prepare_swiglu_params(w1, w2, w3, tff=128)
    out = jax.block_until_ready(swiglu_pallas(x, w13_s, w2t_s, tff_s, tm=8))
    _check(out, swiglu_ref(x, w1, w2, w3))

    # Case 2: rows NOT divisible by the tile -> exercises the padding path.
    out2 = jax.block_until_ready(swiglu_pallas(x2, w13_s, w2t_s, tff_s, tm=8))
    _check(out2, swiglu_ref(x2, w1, w2, w3))

    # Case 3: default (auto-sized ff tile, default row tile) — the production path.
    w13, w2t, tff = prepare_swiglu_params(w1, w2, w3)
    out3 = jax.block_until_ready(swiglu_pallas(x, w13, w2t, tff))
    _check(out3, swiglu_ref(x, w1, w2, w3))

    print("KERNEL_OK")
</pallas_src>

<mosaic_0001>
module attributes {stable_mosaic.version = 11 : i64} {
  func.func @_swiglu_kernel(%arg0: i32, %arg1: i32, %arg2: memref<8x128xf32, #tpu.memory_space<vmem>>, %arg3: memref<128x256xf32, #tpu.memory_space<vmem>>, %arg4: memref<128x128xf32, #tpu.memory_space<vmem>>, %arg5: memref<8x128xf32, #tpu.memory_space<vmem>>, %arg6: memref<8x128xf32, #tpu.memory_space<vmem>>) attributes {dimension_semantics = [#tpu.dimension_semantics<parallel>, #tpu.dimension_semantics<arbitrary>], iteration_bounds = array<i64: 2, 2>, scalar_prefetch = 0 : i64, scratch_operands = 1 : i64, tpu.core_type = #tpu.core_type<tc>, window_params = [{transform_indices = @transform_0, window_bounds = array<i64: 8, 128>}, {transform_indices = @transform_1, window_bounds = array<i64: 128, 256>}, {transform_indices = @transform_2, window_bounds = array<i64: 128, 128>}, {transform_indices = @transform_3, window_bounds = array<i64: 8, 128>}]} {
    %c0_i32 = arith.constant 0 : i32
    %0 = arith.cmpi eq, %arg1, %c0_i32 : i32
    %1 = arith.extui %0 : i1 to i32
    %c0_i32_0 = arith.constant 0 : i32
    %2 = arith.cmpi ne, %1, %c0_i32_0 : i32
    scf.if %2 {
      %cst_13 = arith.constant 0.000000e+00 : f32
      %23 = vector.broadcast %cst_13 : f32 to vector<8x128xf32>
      %c0_14 = arith.constant 0 : index
      %c0_15 = arith.constant 0 : index
      %24 = vector.load %arg6[%c0_14, %c0_15] : memref<8x128xf32, #tpu.memory_space<vmem>>, vector<8x128xf32>
      tpu.vector_store %arg6[%c0_14, %c0_15], %23 {strides = array<i32>} : memref<8x128xf32, #tpu.memory_space<vmem>>, vector<8x128xf32>,
    } else {
    }
    %c0 = arith.constant 0 : index
    %c0_1 = arith.constant 0 : index
    %3 = vector.load %arg2[%c0, %c0_1] : memref<8x128xf32, #tpu.memory_space<vmem>>, vector<8x128xf32>
    %c0_2 = arith.constant 0 : index
    %c0_3 = arith.constant 0 : index
    %4 = vector.load %arg3[%c0_2, %c0_3] : memref<128x256xf32, #tpu.memory_space<vmem>>, vector<128x256xf32>
    %cst = arith.constant dense<0.000000e+00> : vector<8x256xf32>
    %5 = tpu.matmul %3, %4, %cst {dimension_numbers = #tpu.dot_dimension_numbers<[1], [0], [0], [1], [0, 0, 1, 1], [], []>} : vector<8x128xf32>, vector<128x256xf32>, vector<8x256xf32> -> vector<8x256xf32>
    %6 = vector.extract_strided_slice %5 {offsets = [0, 0], sizes = [8, 128], strides = [1, 1]} : vector<8x256xf32> to vector<8x128xf32>
    %7 = vector.extract_strided_slice %5 {offsets = [0, 128], sizes = [8, 128], strides = [1, 1]} : vector<8x256xf32> to vector<8x128xf32>
    %8 = arith.negf %6 : vector<8x128xf32>
    %9 = math.exp %8 : vector<8x128xf32>
    %cst_4 = arith.constant 1.000000e+00 : f32
    %10 = vector.broadcast %cst_4 : f32 to vector<8x128xf32>
    %11 = arith.addf %10, %9 : vector<8x128xf32>
    %12 = arith.divf %10, %11 : vector<8x128xf32>
    %13 = arith.mulf %6, %12 : vector<8x128xf32>
    %14 = arith.mulf %13, %7 : vector<8x128xf32>
    %c0_5 = arith.constant 0 : index
    %c0_6 = arith.constant 0 : index
    %15 = vector.load %arg6[%c0_5, %c0_6] : memref<8x128xf32, #tpu.memory_space<vmem>>, vector<8x128xf32>
    %c0_7 = arith.constant 0 : index
    %c0_8 = arith.constant 0 : index
    %16 = vector.load %arg4[%c0_7, %c0_8] : memref<128x128xf32, #tpu.memory_space<vmem>>, vector<128x128xf32>
    %cst_9 = arith.constant dense<0.000000e+00> : vector<8x128xf32>
    %17 = tpu.matmul %14, %16, %cst_9 {dimension_numbers = #tpu.dot_dimension_numbers<[1], [0], [0], [1], [0, 0, 1, 1], [], []>} : vector<8x128xf32>, vector<128x128xf32>, vector<8x128xf32> -> vector<8x128xf32>
    %18 = arith.addf %15, %17 : vector<8x128xf32>
    %c0_10 = arith.constant 0 : index
    %c0_11 = arith.constant 0 : index
    %19 = vector.load %arg6[%c0_10, %c0_11] : memref<8x128xf32, #tpu.memory_space<vmem>>, vector<8x128xf32>
    tpu.vector_store %arg6[%c0_10, %c0_11], %18 {strides = array<i32>} : memref<8x128xf32, #tpu.memory_space<vmem>>, vector<8x128xf32>,
    %c1_i32 = arith.constant 1 : i32
    %20 = arith.cmpi eq, %arg1, %c1_i32 : i32
    %21 = arith.extui %20 : i1 to i32
    %c0_i32_12 = arith.constant 0 : i32
    %22 = arith.cmpi ne, %21, %c0_i32_12 : i32
    scf.if %22 {
      %c0_13 = arith.constant 0 : index
      %c0_14 = arith.constant 0 : index
      %23 = vector.load %arg6[%c0_13, %c0_14] : memref<8x128xf32, #tpu.memory_space<vmem>>, vector<8x128xf32>
      %c0_15 = arith.constant 0 : index
      %c0_16 = arith.constant 0 : index
      %24 = vector.load %arg5[%c0_15, %c0_16] : memref<8x128xf32, #tpu.memory_space<vmem>>, vector<8x128xf32>
      tpu.vector_store %arg5[%c0_15, %c0_16], %23 {strides = array<i32>} : memref<8x128xf32, #tpu.memory_space<vmem>>, vector<8x128xf32>,
    } else {
    }
    return
  }
  func.func @transform_0(%arg0: i32, %arg1: i32) -> (i32, i32) {
    %c0_i32 = arith.constant 0 : i32
    %c0_i32_0 = arith.constant 0 : i32
    return %arg0, %c0_i32 : i32, i32
  }
  func.func @transform_1(%arg0: i32, %arg1: i32) -> (i32, i32) {
    %c0_i32 = arith.constant 0 : i32
    %c0_i32_0 = arith.constant 0 : i32
    return %c0_i32, %arg1 : i32, i32
  }
  func.func @transform_2(%arg0: i32, %arg1: i32) -> (i32, i32) {
    %c0_i32 = arith.constant 0 : i32
    %c0_i32_0 = arith.constant 0 : i32
    return %arg1, %c0_i32 : i32, i32
  }
  func.func @transform_3(%arg0: i32, %arg1: i32) -> (i32, i32) {
    %c0_i32 = arith.constant 0 : i32
    %c0_i32_0 = arith.constant 0 : i32
    return %arg0, %c0_i32 : i32, i32
  }
}

</mosaic_0001>

<bundles_post_ra>
// kernel: tpu_custom_call.1
= control target key start
LH: loop header
LB: loop body
LE: loop exit
PB: predicated region body
PF: predicated region fallthrough
CT: control target
= control target key end

     0   :  { %s1545_s0 = inlined_call_operand.hbm [shape: f32[16,128], index: 0, kind: input, shape index: {}]   ;;  %s1546_s1 = inlined_call_operand.hbm [shape: f32[128,512], index: 1, kind: input, shape index: {}]   ;;  %s1547_s2 = inlined_call_operand.hbm [shape: f32[256,128], index: 2, kind: input, shape index: {}]   ;;  %s1548_s3 = inlined_call_operand.hbm [shape: f32[16,128], index: 3, kind: output, shape index: {}]  }
   0x1   :  { %1560 = sst [smem:[#allocation19_spill]] %s1546_s1 }
   0x2   :  { %1561 = sst [smem:[#allocation20_spill]] %s1548_s3 }
   0x3   :  { %8 = vsyncpa [#allocation4], 0 }
   0x4   :  { %10 = vsyncpa [#allocation4 + $0x1], 0 }
   0x5   :  { %11 = vsyncpa [#allocation7], 0 }
   0x6   :  { %13 = vsyncpa [#allocation7 + $0x1], 0 }
   0x7   :  { %14 = vsyncpa [#allocation5], 0 }
   0x8   :  { %16 = vsyncpa [#allocation5 + $0x1], 0  ;;  %s1137_s12 = smov 0   ;;  %s1139_s13 = smov 0  }
   0x9   :  { %s1141_s14 = smov 0   ;;  %s1143_s15 = smov 0  }
   0xa   :  { %s1145_s16 = smov 0   ;;  %s1147_s17 = smov 0  }
   0xb   :  { %s1149_s18 = smov 0   ;;  %s1151_s19 = smov 0  }
   0xc   :  { %s1153_s20 = smov 0   ;;  %s1155_s21 = smov 0  }
   0xd   :  { %s1157_s22 = smov 0  }
   0xe LB: > { %1562 = sst [smem:[#allocation13_spill]] %s1082_s17  ;;  %p49_p0 = scmp.eq.s32.totalorder %s1102_s22, 0  ;;  %s1102_s22 = sphi %s1157_s22, %s22_s22   ;;  %s1098_s21 = sphi %s1155_s21, %s1592_s21   ;;  %s1094_s20 = sphi %s1153_s20, %s1600_s20   ;;  %s1090_s19 = sphi %s1151_s19, %s1590_s19   ;;  %s1086_s18 = sphi %s1149_s18, %s1599_s18   ;;  %s1082_s17 = sphi %s1147_s17, %s1598_s17   ;;  %s1078_s16 = sphi %s1145_s16, %s1597_s16   ;;  %s1074_s15 = sphi %s1143_s15, %s1596_s15   ;;  %s1070_s14 = sphi %s1141_s14, %s1595_s14   ;;  %s1066_s13 = sphi %s1139_s13, %s1594_s13   ;;  %s1062_s12 = sphi %s1137_s12, %s1593_s12  }
   0xf   : > { %1563 = sst [smem:[#allocation14_spill]] %s1098_s21  ;;  %s67_s23 = sadd.s32 1, %s1070_s14 }
  0x10   : > { %p74_p1 = scmp.ne.s32.totalorder %s1070_s14, %s1066_s13  ;;  %p1549_p2 = scmp.lt.s32.totalorder %s1102_s22, 4 }
  0x11   : > { %s174_s24 = sand.u32 1, %s1102_s22   ;;  %s1550_s25 = sand.u32 1, %s1070_s14  }
  0x12   : > { %p76_p3 = por %p74_p1, %p49_p0  ;;  %s651_s26 = sshll.u32 %s1094_s20, 8 }
  0x13   : > { %s633_s27 = sshll.u32 %s1550_s25, 8  ;;  %s1564_s1 = sld [smem:[#allocation19_spill]] }
  0x14   : > { %p1211_p4 = pnand %p1549_p2, %p76_p3  ;;  %s178_s5 = scalar_lea.vmem [#allocation6], %s633_s27 }
  0x15   : > { %s185_s6 = sshll.u32 %s178_s5, 4  ;;  %s1217_s7 = scalar_lea.sflag [#allocation7], %s174_s24  ;;  %s1215_s6 = int_to_ptr.vmem [resolvable:$true] %s185_s6 }
  0x16   : > { %p1551_p6 = pneg %p1211_p4 }
  0x19   : > { %s1207_s30 = scalar_lea.hbm %s1564_s1, %s651_s26  ;;  %s891_s11 = scalar_lea.hbm %s1564_s1, 8192 }
  0x1a   : > { %s886_s8 = scalar_lea.hbm %s1207_s30, 4096  ;;  %p892_p9 = scmp.lt.u32.totalorder %s1207_s30, %s1564_s1 }
  0x1b   : > { %p887_p5 = scmp.ne.s32.totalorder %s1207_s30, %s886_s8  ;;  %p893_p10 = scmp.lt.u32.totalorder %s891_s11, %s886_s8 }
  0x1c   : > { %p895_p12 = scmp.lt.u32.totalorder %s886_s8, %s1207_s30 }
  0x1d   : > { %p889_p7 = pnand %p1551_p6, %p887_p5  ;;  %p894_p11 = por %p893_p10, %p892_p9 }
  0x1f   : > { %p890_p8 = pneg %p889_p7  ;;  %p896_p13 = por %p895_p12, %p894_p11 }
  0x21   : > { %p897_p1 = pnand %p896_p13, %p890_p8 }
  0x23   : > { %900 = shalt.err (!%p897_p1)
}
  0x24   : > { %s901_s24 = scalar_lea.vmem %s1215_s6, 4096  ;;  %s1104_s27 = smov [#allocation6]  }
  0x25   : > { %p902_p3 = scmp.ne.s32.totalorder %s1215_s6, %s901_s24  ;;  %s906_s29 = sshll.u32 %s1104_s27, 4  ;;  %s907_s29 = int_to_ptr.vmem [resolvable:$false] %s906_s29 }
  0x26   : > { %s908_s5 = scalar_lea.vmem %s907_s29, 8192  ;;  %p909_p2 = scmp.lt.s32.totalorder %s1215_s6, %s907_s29 }
  0x27   : > { %p904_p5 = pnand %p902_p3, %p1551_p6  ;;  %p910_p9 = scmp.lt.s32.totalorder %s908_s5, %s901_s24 }
  0x29   : > { %p905_p7 = pneg %p904_p5  ;;  %p911_p10 = por %p910_p9, %p909_p2 }
  0x2b   : > { %p912_p11 = pnand %p911_p10, %p905_p7 }
  0x2d   : > { %915 = shalt.err (!%p912_p11)
}
  0x2e   : > { %s1105_s8 = smov 512   ;;  %s1106_s9 = smov 256  }
  0x2f   : > { %s1107_s10 = smov 16   ;;  %p639_p2 = scmp.ge.s32.totalorder %s1102_s22, 1 }
  0x30   : > { %775 = dma.hbm_to_vmem [thread:$0]  (!%p1211_p4), %s1207_s30, 4096, %s1215_s6, %s1217_s7, %s1105_s8, %s1106_s9, %s1107_s10  }
  0x31   : > { %p214_p8 = scmp.lt.s32.totalorder %s1102_s22, 5  ;;  %s1252_s26 = sadd.s32 4294967295, %s1102_s22  }
  0x32   : > { %s628_s28 = sadd.s32 4294967294, %s1102_s22   ;;  %s31_s24 = sadd.s32 1, %s1094_s20 }
  0x33   : > { %p1247_p12 = pnand %p639_p2, %p214_p8  ;;  %p32_p13 = scmp.ge.s32.totalorder %s31_s24, 2 }
  0x34   : > { %s34_s27 = sadd.s32 1, %s1098_s21  ;;  %s41_s30 = sadd.s32 1, %s1082_s17 }
  0x35   : > { %s1566_s11 = scalar_select %p1247_p12, 1, 0 }
  0x36   : > { %p48_p1 = scmp.ne.s32.totalorder %s1082_s17, %s1078_s16  ;;  %s1602_s24 = smov (%p32_p13, %s31_s24), 0 }
  0x37   : > { %1567 = sst [smem:[#allocation15_spill]] %s1602_s24  ;;  %s1604_s27 = smov (!%p32_p13, %s34_s27), %s1098_s21 }
  0x38   : > { %p1268_p3 = por %p49_p0, %p48_p1  ;;  %p54_p5 = scmp.ne.s32.totalorder %s1078_s16, %s1074_s15 }
  0x39   : > { %p36_p7 = scmp.ge.s32.totalorder %s1604_s27, 2  ;;  %p55_p9 = scmp.eq.s32.totalorder %s1252_s26, 0 }
  0x3a   : > { %s64_s29 = ssub.s32 %s1094_s20, %s1602_s24  ;;  %p80_p10 = scmp.ne.s32.totalorder %s1066_s13, %s1062_s12 }
  0x3b   : > { %s1606_s27 = smov (%p36_p7, %s1604_s27), 0  ;;  %p1284_p11 = por %p55_p9, %p54_p5 }
  0x3c   : > { %1569 = sst [smem:[#allocation16_spill]] %s1606_s27  ;;  %p65_p0 = scmp.eq.s32.totalorder %s64_s29, 0 }
  0x3d   : > { %s1570_s5 = scalar_select %p1284_p11, 1, 0 }
  0x3e   : > { %s38_s8 = ssub.s32 %s1098_s21, %s1606_s27  ;;  %p1290_p2 = por %p80_p10, %p55_p9 }
  0x3f   : > { %p39_p8 = scmp.eq.s32.totalorder %s38_s8, 0  ;;  %p130_p13 = scmp.eq.s32.totalorder %s1252_s26, 3 }
  0x40   : > { %s1571_s9 = scalar_select %p1290_p2, 1, 0 }
  0x41   : > { %s1298_s12 = scalar_select %p65_p0, %s1070_s14, %s67_s23  }
  0x42   : > { %s1301_s10 = scalar_select %p39_p8, %s1082_s17, %s41_s30  }
  0x43   : > { %1572 = sst [smem:[#allocation17_spill]] %s1298_s12  ;;  %p1306_p7 = por %p130_p13, %p48_p1 }
  0x44   : > { %1573 = sst [smem:[#allocation18_spill]] %s1301_s10  ;;  %p136_p6 = scmp.eq.s32.totalorder %s628_s28, 3 }
  0x45   : > { %s1574_s25 = scalar_select %p1306_p7, 1, 0 }
  0x46   : > { %s156_s29 = sand.u32 1, %s1082_s17   ;;  %s632_s1 = sshll.u32 %s1098_s21, 7 }
  0x47   : > { %p1315_p9 = por %p136_p6, %p54_p5  ;;  %s631_s8 = sshll.u32 %s156_s29, 3 }
  0x48   : > { %s1322_s23 = scalar_lea.hbm %s1545_s0, %s632_s1  ;;  %p1576_p10 = scmp.lt.s32.totalorder %s1102_s22, 4 }
  0x49   : > { %s1575_s27 = scalar_select %p1315_p9, 1, 0 }
  0x4a   : > { %p1328_p1 = pnand %p1576_p10, %p1268_p3  ;;  %s160_s30 = scalar_lea.vmem [#allocation3], %s631_s8 }
  0x4b   : > { %s167_s21 = sshll.u32 %s160_s30, 4  ;;  %s1578_s10 = sand.u32 1, %s1070_s14   ;;  %s1336_s21 = int_to_ptr.vmem [resolvable:$true] %s167_s21 }
  0x4c   : > { %s1334_s17 = sshll.u32 %s1578_s10, 7  ;;  %s157_s1 = scalar_lea.sflag [#allocation4], %s156_s29 }
  0x4d   : > { %s916_s3 = scalar_lea.hbm %s1322_s23, 128  ;;  %p918_p5 = pneg %p1328_p1 }
  0x4e   : > { %p917_p6 = scmp.ne.s32.totalorder %s1322_s23, %s916_s3  ;;  %s921_s12 = scalar_lea.hbm %s1545_s0, 256 }
  0x4f   : > { %p922_p8 = scmp.lt.u32.totalorder %s1322_s23, %s1545_s0  ;;  %p923_p13 = scmp.lt.u32.totalorder %s921_s12, %s916_s3 }
  0x50   : > { %p919_p3 = pnand %p918_p5, %p917_p6  ;;  %p925_p9 = scmp.lt.u32.totalorder %s916_s3, %s1322_s23 }
  0x51   : > { %p924_p10 = por %p923_p13, %p922_p8 }
  0x52   : > { %p920_p0 = pneg %p919_p3 }
  0x53   : > { %p926_p7 = por %p925_p9, %p924_p10 }
  0x55   : > { %p927_p2 = pnand %p926_p7, %p920_p0 }
  0x57   : > { %930 = shalt.err (!%p927_p2)
}
  0x58   : > { %s931_s10 = scalar_lea.vmem %s1336_s21, 128  ;;  %s1108_s29 = smov [#allocation3]  }
  0x59   : > { %p932_p6 = scmp.ne.s32.totalorder %s1336_s21, %s931_s10  ;;  %s936_s24 = sshll.u32 %s1108_s29, 4  ;;  %s937_s24 = int_to_ptr.vmem [resolvable:$false] %s936_s24 }
  0x5a   : > { %s938_s6 = scalar_lea.vmem %s937_s24, 256  ;;  %p939_p12 = scmp.lt.s32.totalorder %s1336_s21, %s937_s24 }
  0x5b   : > { %p934_p3 = pnand %p932_p6, %p918_p5  ;;  %p940_p8 = scmp.lt.s32.totalorder %s938_s6, %s931_s10 }
  0x5d   : > { %p935_p11 = pneg %p934_p3  ;;  %p941_p13 = por %p940_p8, %p939_p12 }
  0x5f   : > { %p942_p9 = pnand %p941_p13, %p935_p11 }
  0x61   : > { %945 = shalt.err (!%p942_p9)
}
  0x62   : > { %772 = dma.hbm_to_vmem [thread:$0]  (!%p1328_p1), %s1322_s23, 128, %s1336_s21, %s157_s1  }
  0x63   : > { %s652_s12 = sshll.u32 %s1094_s20, 11  ;;  %s199_s10 = scalar_lea.vmem [#allocation8], %s1334_s17 }
  0x64   : > { %s1367_s30 = scalar_lea.hbm %s1547_s2, %s652_s12  ;;  %s206_s29 = sshll.u32 %s199_s10, 4  ;;  %s1370_s29 = int_to_ptr.vmem [resolvable:$true] %s206_s29 }
  0x65   : > { %s946_s28 = scalar_lea.hbm %s1367_s30, 2048  ;;  %p1579_p11 = pneg %p1211_p4 }
  0x66   : > { %p947_p12 = scmp.ne.s32.totalorder %s1367_s30, %s946_s28  ;;  %s951_s1 = scalar_lea.hbm %s1547_s2, 4096 }
  0x67   : > { %p952_p1 = scmp.lt.u32.totalorder %s1367_s30, %s1547_s2  ;;  %p953_p5 = scmp.lt.u32.totalorder %s951_s1, %s946_s28 }
  0x68   : > { %p949_p2 = pnand %p947_p12, %p1579_p11  ;;  %p955_p10 = scmp.lt.u32.totalorder %s946_s28, %s1367_s30 }
  0x69   : > { %p954_p0 = por %p953_p5, %p952_p1 }
  0x6a   : > { %p950_p7 = pneg %p949_p2 }
  0x6b   : > { %p956_p6 = por %p955_p10, %p954_p0 }
  0x6d   : > { %p957_p3 = pnand %p956_p6, %p950_p7 }
  0x6f   : > { %960 = shalt.err (!%p957_p3)
}
  0x70   : > { %s961_s17 = scalar_lea.vmem %s1370_s29, 2048  ;;  %p1580_p13 = pmov %p1579_p11 }
  0x71   : > { %p962_p8 = scmp.ne.s32.totalorder %s1370_s29, %s961_s17  ;;  %s1109_s12 = smov [#allocation8]  }
  0x72   : > { %s966_s3 = sshll.u32 %s1109_s12, 4  ;;  %s967_s3 = int_to_ptr.vmem [resolvable:$false] %s966_s3 }
  0x73   : > { %p964_p9 = pnand %p962_p8, %p1580_p13  ;;  %s968_s8 = scalar_lea.vmem %s967_s3, 4096 }
  0x74   : > { %p969_p11 = scmp.lt.s32.totalorder %s1370_s29, %s967_s3  ;;  %p970_p2 = scmp.lt.s32.totalorder %s968_s8, %s961_s17 }
  0x75   : > { %p965_p12 = pneg %p964_p9 }
  0x76   : > { %p971_p1 = por %p970_p2, %p969_p11 }
  0x78   : > { %p972_p5 = pnand %p971_p1, %p965_p12 }
  0x7a   : > { %975 = shalt.err (!%p972_p5)
}
  0x7b   : > { %s1110_s10 = smov 128   ;;  %s1111_s28 = smov 8  }
  0x7c   : > { %778 = dma.hbm_to_vmem [thread:$0]  (!%p1211_p4), %s1367_s30, 2048, %s1370_s29, %s1217_s7, %s1110_s10, %s1110_s10, %s1111_s28  }
  0x7d   : > { %p1581_p7 = scmp.ne.s32.totalorder %s1566_s11, 0 }
  0x7e   : > { %s1399_s21 = sand.u32 (!%p1581_p7), 1, %s1078_s16   ;;  %p1582_p0 = scmp.ne.s32.totalorder (!%p1581_p7), %s1570_s5, 0 }
  0x7f   : > { %218 = sbr.rel (%p1581_p7) target bundleno = 676 (0x2a4), region = 32  ;;  %s640_s23 = sshll.u32 (!%p1581_p7), %s1399_s21, 3 }
  0x80   : > { %s221_s1 = scalar_lea.sflag (!%p1581_p7), [#allocation4], %s1399_s21  ;;  %s1403_s24 = scalar_lea.vmem (!%p1581_p7), [#allocation3], %s640_s23 }
  0x86   : > { %1049 = dma.done.wait (%p1582_p0), %s221_s1, 128  }
  0x87   : > { %1051 = vsyncadd (%p1582_p0), %s221_s1, 4294967168  ;;  %s229_s4 = sand.u32 1, %s1252_s26   ;;  %s231_s7 = sand.u32 1, %s1066_s13  }
  0x88   : > { %s641_s11 = sshll.u32 %s231_s7, 8  ;;  %s230_s30 = scalar_lea.sflag [#allocation7], %s229_s4 }
  0x89   : > { %s1411_s29 = scalar_lea.vmem [#allocation6], %s641_s11  ;;  %p1583_p4 = scmp.ne.s32.totalorder %s1571_s9, 0 }
  0x8b   : > { %1053 = dma.done.wait (%p1583_p4), %s230_s30, 6144  }
  0x8c   : > { %1055 = vsyncadd (%p1583_p4), %s230_s30, 4294961152  ;;  %s642_s6 = sshll.u32 %s231_s7, 7  ;;  %s1419_s12 = scalar_lea.vmem [#allocation9], %s640_s23 }
  0x8d   : > { %s1417_s17 = scalar_lea.vmem [#allocation8], %s642_s6  ;;  %p644_p10 = scmp.ne.s32.totalorder %s1086_s18, 0 }
  0x8e   : > { %v1112_v0 = vmov (!%p644_p10), 0.0  }
  0x8f   : > { %280 = sbr.rel (%p644_p10) target bundleno = 150 (0x96), region = 48  ;;  %281 = vst [vmem:[#allocation2] sm:$0xff] (!%p644_p10), %v1112_v0 }
  0x96 PF: > { %v284_v1 = vld [vmem:[%s1411_s29 + $0x8] sm:$0xff]  ;;  %v286_v2 = vld [vmem:[%s1411_s29 + $0x18] sm:$0xff]  ;;  %v283_v3 = vld [vmem:[%s1411_s29] sm:$0xff]  ;;  %v1113_v8 = vmov 0.0   ;;  %v1114_v9 = vmov 0.0|0.0   ;;  %vm1115_vm0 = vmmov 0  }
  0x97   : > { %v705_v4 = vpack.c.bf16 %v286_v2, %v284_v1  ;;  %v285_v5 = vld [vmem:[%s1411_s29 + $0x10] sm:$0xff]  ;;  %v288_v6 = vld [vmem:[%s1411_s29 + $0x28] sm:$0xff]  ;;  %v290_v7 = vld [vmem:[%s1411_s29 + $0x38] sm:$0xff]  ;;  %379 = vmatprep.mubr.f32.mxu0 %v1113_v8  ;;  %737 = vmatprep.subr.bf16.mxu1 %v1114_v9  ;;  %p646_p6 = scmp.ne.s32.totalorder %s1086_s18, 1 }
  0x98   : > { %v707_v10 = vpack.c.bf16 %v285_v5, %v283_v3  ;;  %v709_v11 = vpack.c.bf16 %v290_v7, %v288_v6  ;;  %v287_v12 = vld [vmem:[%s1411_s29 + $0x20] sm:$0xff]  ;;  %v289_v13 = vld [vmem:[%s1411_s29 + $0x30] sm:$0xff]  ;;  %v292_v14 = vld [vmem:[%s1411_s29 + $0x48] sm:$0xff]  ;;  %702 = vmatprep.mubr.msk.f32.mxu1 %vm1115_vm0, %v1113_v8 }
  0x99   : > { %706 = vmatprep.subr.bf16.mxu0 %v705_v4  ;;  %v294_v15 = vld [vmem:[%s1411_s29 + $0x58] sm:$0xff]  ;;  %v711_v16 = vpack.c.bf16 %v289_v13, %v287_v12  ;;  %v291_v18 = vld [vmem:[%s1411_s29 + $0x40] sm:$0xff]  ;;  %v293_v19 = vld [vmem:[%s1411_s29 + $0x50] sm:$0xff] }
  0x9a   : > { %708 = vmatpush1.bf16.msra.mxu0 %v707_v10  ;;  %v713_v17 = vpack.c.bf16 %v294_v15, %v292_v14  ;;  %v296_v20 = vld [vmem:[%s1411_s29 + $0x68] sm:$0xff]  ;;  %v298_v21 = vld [vmem:[%s1411_s29 + $0x78] sm:$0xff]  ;;  %v715_v22 = vpack.c.bf16 %v293_v19, %v291_v18  ;;  %v295_v24 = vld [vmem:[%s1411_s29 + $0x60] sm:$0xff] }
  0x9b   : > { %710 = vmatprep.subr.bf16.mxu0 %v709_v11  ;;  %v717_v23 = vpack.c.bf16 %v298_v21, %v296_v20  ;;  %v297_v25 = vld [vmem:[%s1411_s29 + $0x70] sm:$0xff]  ;;  %v300_v26 = vld [vmem:[%s1411_s29 + $0x88] sm:$0xff]  ;;  %v302_v27 = vld [vmem:[%s1411_s29 + $0x98] sm:$0xff] }
  0x9c   : > { %v719_v28 = vpack.c.bf16 %v297_v25, %v295_v24  ;;  %v721_v29 = vpack.c.bf16 %v302_v27, %v300_v26  ;;  %v299_v30 = vld [vmem:[%s1411_s29 + $0x80] sm:$0xff]  ;;  %v301_v31 = vld [vmem:[%s1411_s29 + $0x90] sm:$0xff]  ;;  %v304_v32 = vld [vmem:[%s1411_s29 + $0xa8] sm:$0xff] }
  0x9d   : > { %v306_v33 = vld [vmem:[%s1411_s29 + $0xb8] sm:$0xff]  ;;  %v723_v34 = vpack.c.bf16 %v301_v31, %v299_v30  ;;  %v303_v36 = vld [vmem:[%s1411_s29 + $0xa0] sm:$0xff]  ;;  %v305_v37 = vld [vmem:[%s1411_s29 + $0xb0] sm:$0xff] }
  0x9e   : > { %712 = vmatpush1.bf16.msra.mxu0 %v711_v16  ;;  %v725_v35 = vpack.c.bf16 %v306_v33, %v304_v32  ;;  %v308_v38 = vld [vmem:[%s1411_s29 + $0xc8] sm:$0xff]  ;;  %v310_v39 = vld [vmem:[%s1411_s29 + $0xd8] sm:$0xff]  ;;  %v727_v40 = vpack.c.bf16 %v305_v37, %v303_v36  ;;  %v307_v42 = vld [vmem:[%s1411_s29 + $0xc0] sm:$0xff] }
  0x9f   : > { %714 = vmatprep.subr.bf16.mxu0 %v713_v17  ;;  %v729_v41 = vpack.c.bf16 %v310_v39, %v308_v38  ;;  %v309_v43 = vld [vmem:[%s1411_s29 + $0xd0] sm:$0xff]  ;;  %v312_v44 = vld [vmem:[%s1411_s29 + $0xe8] sm:$0xff]  ;;  %v314_v45 = vld [vmem:[%s1411_s29 + $0xf8] sm:$0xff] }
  0xa0   : > { %v731_v46 = vpack.c.bf16 %v309_v43, %v307_v42  ;;  %v733_v47 = vpack.c.bf16 %v314_v45, %v312_v44  ;;  %v311_v48 = vld [vmem:[%s1411_s29 + $0xe0] sm:$0xff]  ;;  %v313_v49 = vld [vmem:[%s1411_s29 + $0xf0] sm:$0xff]  ;;  %v396_v53 = vld [vmem:[%s1417_s17 + $0x8] sm:$0xff] }
  0xa1   : > { %v735_v50 = vpack.c.bf16 %v313_v49, %v311_v48  ;;  %v282_v51 = vld [vmem:[%s1403_s24] sm:$0xff]  ;;  %v395_v52 = vld [vmem:[%s1417_s17] sm:$0xff]  ;;  %v400_v59 = vld [vmem:[%s1417_s17 + $0x28] sm:$0xff] }
  0xa2   : > { %716 = vmatpush1.bf16.msra.mxu0 %v715_v22  ;;  %v738_v54 = vpack.c.bf16 %v396_v53, %v395_v52  ;;  %v397_v55 = vld [vmem:[%s1417_s17 + $0x10] sm:$0xff]  ;;  %v398_v56 = vld [vmem:[%s1417_s17 + $0x18] sm:$0xff]  ;;  %v399_v58 = vld [vmem:[%s1417_s17 + $0x20] sm:$0xff] }
  0xa3   : > { %718 = vmatprep.subr.bf16.mxu0 %v717_v23  ;;  %v741_v57 = vpack.c.bf16 %v398_v56, %v397_v55  ;;  %v744_v60 = vpack.c.bf16 %v400_v59, %v399_v58  ;;  %v401_v61 = vld [vmem:[%s1417_s17 + $0x30] sm:$0xff]  ;;  %v402_v62 = vld [vmem:[%s1417_s17 + $0x38] sm:$0xff]  ;;  %v403_v0 = vld [vmem:[%s1417_s17 + $0x40] sm:$0xff] }
  0xa4   : > { %739 = vmatpush3.bf16.msra.mxu1 %v738_v54  ;;  %v747_v63 = vpack.c.bf16 %v402_v62, %v401_v61  ;;  %v404_v1 = vld [vmem:[%s1417_s17 + $0x48] sm:$0xff]  ;;  %v405_v3 = vld [vmem:[%s1417_s17 + $0x50] sm:$0xff]  ;;  %v406_v4 = vld [vmem:[%s1417_s17 + $0x58] sm:$0xff] }
  0xa5   : > { %740 = vmatprep.subr.bf16.mxu1 %v1114_v9  ;;  %v750_v2 = vpack.c.bf16 %v404_v1, %v403_v0  ;;  %v753_v5 = vpack.c.bf16 %v406_v4, %v405_v3  ;;  %v407_v6 = vld [vmem:[%s1417_s17 + $0x60] sm:$0xff]  ;;  %v408_v7 = vld [vmem:[%s1417_s17 + $0x68] sm:$0xff]  ;;  %v409_v11 = vld [vmem:[%s1417_s17 + $0x70] sm:$0xff] }
  0xa6   : > { %720 = vmatpush1.bf16.msra.mxu0 %v719_v28  ;;  %v756_v10 = vpack.c.bf16 %v408_v7, %v407_v6  ;;  %v410_v12 = vld [vmem:[%s1417_s17 + $0x78] sm:$0xff]  ;;  %v394_v22 = vld [vmem:[#allocation2] sm:$0xff] }
  0xa7   : > { %722 = vmatprep.subr.bf16.mxu0 %v721_v29  ;;  %v759_v13 = vpack.c.bf16 %v410_v12, %v409_v11 }
  0xa8   : > { %742 = vmatpush3.bf16.msra.mxu1 %v741_v57 }
  0xa9   : > { %743 = vmatprep.subr.bf16.mxu1 %v1114_v9 }
  0xaa   : > { %724 = vmatpush1.bf16.msra.mxu0 %v723_v34 }
  0xab   : > { %726 = vmatprep.subr.bf16.mxu0 %v725_v35 }
  0xac   : > { %745 = vmatpush3.bf16.msra.mxu1 %v744_v60 }
  0xad   : > { %746 = vmatprep.subr.bf16.mxu1 %v1114_v9 }
  0xae   : > { %728 = vmatpush1.bf16.msra.mxu0 %v727_v40 }
  0xaf   : > { %730 = vmatprep.subr.bf16.mxu0 %v729_v41 }
  0xb0   : > { %748 = vmatpush3.bf16.msra.mxu1 %v747_v63 }
  0xb1   : > { %749 = vmatprep.subr.bf16.mxu1 %v1114_v9 }
  0xb2   : > { %732 = vmatpush1.bf16.msra.mxu0 %v731_v46 }
  0xb3   : > { %734 = vmatprep.subr.bf16.mxu0 %v733_v47 }
  0xb4   : > { %751 = vmatpush3.bf16.msra.mxu1 %v750_v2 }
  0xb5   : > { %752 = vmatprep.subr.bf16.mxu1 %v1114_v9 }
  0xb6   : > { %736 = vmatpush1.bf16.msra.mxu0 %v735_v50 }
  0xb8   : > { %754 = vmatpush3.bf16.msra.mxu1 %v753_v5 }
  0xb9   : > { %380 = vmatmul.mubr.f32.vlgmr.msra.gmra.mrb[0].mxu0 %v282_v51  ;;  %755 = vmatprep.subr.bf16.mxu1 %v1114_v9 }
  0xbc   : > { %757 = vmatpush3.bf16.msra.mxu1 %v756_v10 }
  0xbd   : > { %758 = vmatprep.subr.bf16.mxu1 %v1114_v9 }
  0xc0   : > { %760 = vmatpush3.bf16.msra.mxu1 %v759_v13 }
 0x18c   : > { %v381_v14 = vpop.f32.mrb[0].mxu0 }
 0x18d   : > { %v645_v15 = vmul.f32 -1.442695, %v381_v14  ;;  %v383_v16 = vpop.f32.mrb[1].mxu0 }
 0x18f   : > { %882 = vpow2.f32 %v645_v15 }
 0x199   : > { %v883_v17 = vpop.eup %882 }
 0x19a   : > { %v389_v18 = vadd.f32 1.0, %v883_v17 }
 0x19c   : > { %884 = vrcp.f32 %v389_v18 }
 0x1a6   : > { %v885_v19 = vpop.eup %884 }
 0x1a7   : > { %v392_v20 = vmul.f32 %v885_v19, %v381_v14 }
 0x1a9   : > { %v393_v21 = vmul.f32 %v392_v20, %v383_v16 }
 0x1ab   : > { %703 = vmatmul.mubr.f32.vlgmr.msra.gmra.mrb[0].mxu1 %v393_v21 }
 0x27b   : > { %486 = sbr.rel (%p646_p6) target bundleno = 650 (0x28a), region = 52 }
 0x27e   : > { %v477_v9 = vpop.f32.mrb[0].mxu1 }
 0x27f   : > { %v481_v23 = vadd.f32 %v477_v9, %v394_v22  ;;  %v704_v24 = vpop.f32.mrb[1].mxu1 }
 0x281   : > { %482 = vst [vmem:[#allocation2] sm:$0xff] %v481_v23 }
 0x288   : > { %v487_v8 = vld [vmem:[#allocation2] sm:$0xff] }
 0x289   : > { %488 = vst [vmem:[%s1419_s12] sm:$0xff] %v487_v8 }
 0x28a PF: > { %s648_s26 = sshll.u32 %s1090_s19, 7  ;;  %s1584_s3 = sld [smem:[#allocation20_spill]] }
 0x28b   : > { %s503_s10 = sshll.u32 %s1419_s12, 4  ;;  %s490_s28 = scalar_lea.sflag [#allocation5], %s1399_s21  ;;  %s504_s10 = int_to_ptr.vmem [resolvable:$true] %s503_s10 }
 0x28c   : > { %s976_s23 = scalar_lea.vmem %s504_s10, 128  ;;  %p1585_p8 = scmp.ne.s32.totalorder %s1574_s25, 0 }
 0x28d   : > { %p977_p3 = scmp.ne.s32.totalorder %s504_s10, %s976_s23  ;;  %s1116_s18 = smov [#allocation9]  }
 0x28e   : > { %s980_s1 = sshll.u32 %s1116_s18, 4  ;;  %s981_s1 = int_to_ptr.vmem [resolvable:$false] %s980_s1 }
 0x28f   : > { %p978_p13 = pnand %p977_p3, %p1585_p8  ;;  %s982_s24 = scalar_lea.vmem %s981_s1, 256 }
 0x290   : > { %s1487_s8 = scalar_lea.hbm %s1584_s3, %s648_s26  ;;  %p983_p12 = scmp.lt.s32.totalorder %s504_s10, %s981_s1 }
 0x291   : > { %p979_p9 = pneg %p978_p13  ;;  %p984_p11 = scmp.lt.s32.totalorder %s982_s24, %s976_s23 }
 0x293   : > { %p985_p2 = por %p984_p11, %p983_p12 }
 0x295   : > { %p986_p1 = pnand %p985_p2, %p979_p9 }
 0x297   : > { %989 = shalt.err (!%p986_p1)
}
 0x298   : > { %s990_s19 = scalar_lea.hbm %s1487_s8, 128  ;;  %s994_s7 = scalar_lea.hbm %s1584_s3, 256 }
 0x299   : > { %p991_p5 = scmp.ne.s32.totalorder %s1487_s8, %s990_s19  ;;  %p995_p4 = scmp.lt.u32.totalorder %s1487_s8, %s1584_s3 }
 0x29a   : > { %p996_p10 = scmp.lt.u32.totalorder %s994_s7, %s990_s19  ;;  %p998_p3 = scmp.lt.u32.totalorder %s990_s19, %s1487_s8 }
 0x29b   : > { %p992_p7 = pnand %p991_p5, %p1585_p8 }
 0x29c   : > { %p997_p6 = por %p996_p10, %p995_p4 }
 0x29d   : > { %p993_p0 = pneg %p992_p7 }
 0x29e   : > { %p999_p13 = por %p998_p3, %p997_p6 }
 0x2a0   : > { %p1000_p9 = pnand %p999_p13, %p993_p0 }
 0x2a2   : > { %1003 = shalt.err (!%p1000_p9)
}
 0x2a3   : > { %767 = dma.vmem_to_hbm [thread:$0]  (%p1585_p8), %s504_s10, 128, %s1487_s8, %s490_s28  }
 0x2a4 PF: > { %p784_p12 = scmp.ge.s32.totalorder %s1102_s22, 2  ;;  %s515_s29 = sand.u32 1, %s1074_s15  }
 0x2a5   : > { %p1586_p11 = scmp.ne.s32.totalorder %s1575_s27, 0  ;;  %s516_s6 = scalar_lea.sflag [#allocation5], %s515_s29 }
 0x2a7   : > { %p780_p2 = pnand %p784_p12, %p1586_p11 }
 0x2a9   : > { %1057 = dma.done.wait (!%p780_p2), %s516_s6, 128  }
 0x2aa   : > { %1059 = vsyncadd (!%p780_p2), %s516_s6, 4294967168  ;;  %s22_s22 = sadd.s32 1, %s1102_s22   ;;  %s1587_s17 = sld [smem:[#allocation17_spill]] }
 0x2ab   : > { %p19_p1 = scmp.ge.s32.totalorder %s22_s22, 6   ;;  %s1588_s25 = sld [smem:[#allocation13_spill]] }
 0x2ac   : > { %s1589_s26 = sld [smem:[#allocation18_spill]]  ;;  %s1590_s19 = sld [smem:[#allocation14_spill]] }
 0x2ad   : > { %s1591_s5 = sld [smem:[#allocation15_spill]]  ;;  %s1592_s21 = sld [smem:[#allocation16_spill]] }
 0x2ae   : > { %s1593_s12 = smov %s1066_s13  ;;  %s1594_s13 = smov %s1070_s14 }
 0x2af   : > { %s1596_s15 = smov %s1078_s16  ;;  %s1599_s18 = smov %s1094_s20 }
 0x2b0   : > { %s1595_s14 = smov %s1587_s17  ;;  %21 = sbr.rel (!%p19_p1) target bundleno = 14 (0xe), region = 109 }
 0x2b1   : > { %s1597_s16 = smov %s1588_s25 }
 0x2b2   : > { %s1598_s17 = smov %s1589_s26 }
 0x2b3   : > { %s1600_s20 = smov %s1591_s5 }
 0x2b7   :  { %521 = vsyncpa [#allocation4], 1 }
 0x2b8   :  { %523 = vsyncpa [#allocation4 + $0x1], 1 }
 0x2b9   :  { %524 = vsyncpa [#allocation7], 1 }
 0x2ba   :  { %526 = vsyncpa [#allocation7 + $0x1], 1 }
 0x2bb   :  { %527 = vsyncpa [#allocation5], 1 }
 0x2bc   :  { %529 = vsyncpa [#allocation5 + $0x1], 1 }

</bundles_post_ra>
